<compile_context>
chip_gen: v6e
topology: v6e:2x2x1
jax: 0.10.0
libtpu: 0.0.40
codegen_flags: <defaults>
</compile_context>

<pallas_src>
import jax
import jax.numpy as jnp
from jax.experimental import pallas as pl
from jax.experimental.pallas import tpu as pltpu

LANE = 128
SUBLANE = 8
DEFAULT_TILE_B = 1024       # rows per grid step (multiple of 8; 256-multiples feed MXU M cleanly)
MIN_ROWS_PER_CORE = 512     # once B >= 2*this, force >= 2 grid steps (keep both v7x TCs busy)


def _round_up(n, m):
    return ((n + m - 1) // m) * m


def mlp2_kernel(x_ref, w1_ref, b1_ref, w2_ref, b2_ref, w3_ref, b3_ref, o_ref):
    # x arrives at native feature width; zero-pad to w1's 128-lane fan-in in
    # VMEM (zeros are exact through matmul + ReLU).
    x = x_ref[...]
    k_pad = w1_ref.shape[0] - x.shape[1]
    if k_pad:
        x = jnp.pad(x, ((0, 0), (0, k_pad)))
    x = x.astype(w1_ref.dtype)

    # Layer 1: Linear(in, 128) + ReLU   (MXU accumulate f32, epilogue f32)
    h1 = jnp.dot(x, w1_ref[...], preferred_element_type=jnp.float32)
    h1 = jnp.maximum(h1 + b1_ref[...], 0.0)

    # Layer 2: Linear(128, 64) + ReLU
    h2 = jnp.dot(h1.astype(w2_ref.dtype), w2_ref[...], preferred_element_type=jnp.float32)
    h2 = jnp.maximum(h2 + b2_ref[...], 0.0)

    # Layer 3: Linear(64, out_dim), no activation; native-width contiguous store.
    out = jnp.dot(h2.astype(w3_ref.dtype), w3_ref[...], preferred_element_type=jnp.float32)
    o_ref[...] = (out + b3_ref[...]).astype(o_ref.dtype)


def mlp2_forward(x, params, tile_b=DEFAULT_TILE_B, compute_dtype=jnp.float32):
    """x: [B, in_dim] float32. params: w* as [fan_in, fan_out], b* as [1, fan_out]."""
    w1, b1, w2, b2, w3, b3 = (params[k] for k in ("w1", "b1", "w2", "b2", "w3", "b3"))
    B, in_dim = x.shape
    h1_dim = w1.shape[1]            # 128
    h2_dim = w2.shape[1]            # 64
    out_dim = w3.shape[1]           # e.g. 22

    # Only w1's fan-in is padded to the lane width (x is padded to match inside
    # the kernel).  Hidden and output widths stay native.
    in_p = _round_up(in_dim, LANE)
    w1p = jnp.pad(w1, ((0, in_p - in_dim), (0, 0))).astype(compute_dtype)
    w2c = w2.astype(compute_dtype)
    w3c = w3.astype(compute_dtype)

    # Adaptive batch tile: bounded padding waste, >= 2 parallel steps at big B.
    num_tiles = pl.cdiv(B, tile_b)
    if B >= 2 * MIN_ROWS_PER_CORE:
        num_tiles = max(num_tiles, 2)
    tb = _round_up(pl.cdiv(B, num_tiles), SUBLANE)
    B_pad = num_tiles * tb

    xc = x.astype(compute_dtype)
    if B_pad > B:
        xc = jnp.pad(xc, ((0, B_pad - B), (0, 0)))   # tiny: native feature width

    def _resident(a):  # full-array block, constant index -> stays VMEM-resident
        return pl.BlockSpec(a.shape, lambda i: (0, 0))

    itemsize = jnp.dtype(compute_dtype).itemsize
    flops = 2 * B_pad * (in_p * h1_dim + h1_dim * h2_dim + h2_dim * out_dim)
    bytes_accessed = (
        B_pad * in_dim * itemsize + B_pad * out_dim * 4
        + (w1p.size + w2c.size + w3c.size) * itemsize
        + (b1.size + b2.size + b3.size) * 4
    )

    out = pl.pallas_call(
        mlp2_kernel,
        out_shape=jax.ShapeDtypeStruct((B_pad, out_dim), jnp.float32),
        grid=(num_tiles,),
        in_specs=[
            pl.BlockSpec((tb, in_dim), lambda i: (i, 0)),   # x: native width, batch-tiled
            _resident(w1p), _resident(b1),
            _resident(w2c), _resident(b2),
            _resident(w3c), _resident(b3),
        ],
        out_specs=pl.BlockSpec((tb, out_dim), lambda i: (i, 0)),
        compiler_params=pltpu.CompilerParams(
            dimension_semantics=("parallel",),
        ),
        cost_estimate=pl.CostEstimate(
            flops=flops, transcendentals=0, bytes_accessed=bytes_accessed),
    )(xc, w1p, b1, w2c, b2, w3c, b3)

    return out[:B] if B_pad > B else out


def init_params(key, in_dim, out_dim):
    """Deterministic synthetic init; weights stored as [fan_in, fan_out] (transposed vs. torch)."""
    ks = jax.random.split(key, 6)

    def lin(kw, kb, fan_in, fan_out):
        bound = 1.0 / jnp.sqrt(fan_in)
        w = jax.random.uniform(kw, (fan_in, fan_out), jnp.float32, -bound, bound)
        b = jax.random.uniform(kb, (1, fan_out), jnp.float32, -bound, bound)
        return w, b

    w1, b1 = lin(ks[0], ks[1], in_dim, 128)
    w2, b2 = lin(ks[2], ks[3], 128, 64)
    w3, b3 = lin(ks[4], ks[5], 64, out_dim)
    return dict(w1=w1, b1=b1, w2=w2, b2=b2, w3=w3, b3=b3)


def reference_forward(x, p):
    h1 = jnp.maximum(x @ p["w1"] + p["b1"], 0.0)
    h2 = jnp.maximum(h1 @ p["w2"] + p["b2"], 0.0)
    return h2 @ p["w3"] + p["b3"]


if __name__ == "__main__":
    # Crop-recommendation style shapes: 7 input features, 22 output classes.
    in_dim, out_dim = 7, 22
    key = jax.random.PRNGKey(0)
    kp, k1, k2, k3 = jax.random.split(key, 4)
    params = init_params(kp, in_dim, out_dim)

    # Small batch: single grid step, tile shrinks to 8 rows.
    x1 = jax.random.normal(k1, (8, in_dim), jnp.float32)
    o1 = jax.block_until_ready(mlp2_forward(x1, params))
    assert o1.shape == (8, out_dim)
    assert jnp.allclose(o1, reference_forward(x1, params), atol=1e-5, rtol=1e-5)

    # Non-multiple batch: adaptive tile (tb=304) bounds padding waste to 4 rows.
    x2 = jax.random.normal(k2, (300, in_dim), jnp.float32)
    o2 = jax.block_until_ready(mlp2_forward(x2, params))
    assert o2.shape == (300, out_dim)
    assert jnp.allclose(o2, reference_forward(x2, params), atol=1e-5, rtol=1e-5)

    # Larger batch: >= 2 parallel grid steps (v7x dual-TC path) in f32, plus the
    # bf16-operand fast path (f32 accumulate) with relaxed tolerance.
    x3 = jax.random.normal(k3, (1300, in_dim), jnp.float32)
    ref3 = reference_forward(x3, params)
    o3 = jax.block_until_ready(mlp2_forward(x3, params))
    assert o3.shape == (1300, out_dim)
    assert jnp.allclose(o3, ref3, atol=1e-5, rtol=1e-5)

    o3_bf16 = jax.block_until_ready(
        mlp2_forward(x3, params, compute_dtype=jnp.bfloat16))
    assert jnp.allclose(o3_bf16, ref3, atol=1e-1, rtol=1e-1)

    print("KERNEL_OK")
</pallas_src>

<mosaic_0001>
module attributes {stable_mosaic.version = 11 : i64} {
  func.func @mlp2_kernel(%arg0: i32, %arg1: memref<8x7xf32, #tpu.memory_space<vmem>>, %arg2: memref<128x128xf32, #tpu.memory_space<vmem>>, %arg3: memref<1x128xf32, #tpu.memory_space<vmem>>, %arg4: memref<128x64xf32, #tpu.memory_space<vmem>>, %arg5: memref<1x64xf32, #tpu.memory_space<vmem>>, %arg6: memref<64x22xf32, #tpu.memory_space<vmem>>, %arg7: memref<1x22xf32, #tpu.memory_space<vmem>>, %arg8: memref<8x22xf32, #tpu.memory_space<vmem>>) attributes {dimension_semantics = [#tpu.dimension_semantics<parallel>], iteration_bounds = array<i64: 1>, scalar_prefetch = 0 : i64, scratch_operands = 0 : i64, tpu.core_type = #tpu.core_type<tc>, window_params = [{transform_indices = @transform_0, window_bounds = array<i64: 8, 7>}, {pipeline_mode = #tpu.pipeline_mode<synchronous>, transform_indices = @transform_1, window_bounds = array<i64: 128, 128>}, {pipeline_mode = #tpu.pipeline_mode<synchronous>, transform_indices = @transform_2, window_bounds = array<i64: 1, 128>}, {pipeline_mode = #tpu.pipeline_mode<synchronous>, transform_indices = @transform_3, window_bounds = array<i64: 128, 64>}, {pipeline_mode = #tpu.pipeline_mode<synchronous>, transform_indices = @transform_4, window_bounds = array<i64: 1, 64>}, {pipeline_mode = #tpu.pipeline_mode<synchronous>, transform_indices = @transform_5, window_bounds = array<i64: 64, 22>}, {pipeline_mode = #tpu.pipeline_mode<synchronous>, transform_indices = @transform_6, window_bounds = array<i64: 1, 22>}, {transform_indices = @transform_7, window_bounds = array<i64: 8, 22>}]} {
    %c0 = arith.constant 0 : index
    %c0_0 = arith.constant 0 : index
    %0 = vector.load %arg1[%c0, %c0_0] : memref<8x7xf32, #tpu.memory_space<vmem>>, vector<8x7xf32>
    %c0_i32 = arith.constant 0 : i32
    %1 = arith.sitofp %c0_i32 : i32 to f32
    %2 = vector.broadcast %1 : f32 to vector<8x121xf32>
    %3 = tpu.concatenate %0, %2 in 1 : vector<8x7xf32>, vector<8x121xf32> -> vector<8x128xf32>
    %c0_1 = arith.constant 0 : index
    %c0_2 = arith.constant 0 : index
    %4 = vector.load %arg2[%c0_1, %c0_2] : memref<128x128xf32, #tpu.memory_space<vmem>>, vector<128x128xf32>
    %cst = arith.constant dense<0.000000e+00> : vector<8x128xf32>
    %5 = tpu.matmul %3, %4, %cst {dimension_numbers = #tpu.dot_dimension_numbers<[1], [0], [0], [1], [0, 0, 1, 1], [], []>} : vector<8x128xf32>, vector<128x128xf32>, vector<8x128xf32> -> vector<8x128xf32>
    %c0_3 = arith.constant 0 : index
    %c0_4 = arith.constant 0 : index
    %6 = vector.load %arg3[%c0_3, %c0_4] : memref<1x128xf32, #tpu.memory_space<vmem>>, vector<1x128xf32>
    %7 = vector.broadcast %6 : vector<1x128xf32> to vector<8x128xf32>
    %8 = arith.addf %5, %7 : vector<8x128xf32>
    %cst_5 = arith.constant 0.000000e+00 : f32
    %9 = vector.broadcast %cst_5 : f32 to vector<8x128xf32>
    %10 = arith.maximumf %8, %9 : vector<8x128xf32>
    %c0_6 = arith.constant 0 : index
    %c0_7 = arith.constant 0 : index
    %11 = vector.load %arg4[%c0_6, %c0_7] : memref<128x64xf32, #tpu.memory_space<vmem>>, vector<128x64xf32>
    %cst_8 = arith.constant dense<0.000000e+00> : vector<8x64xf32>
    %12 = tpu.matmul %10, %11, %cst_8 {dimension_numbers = #tpu.dot_dimension_numbers<[1], [0], [0], [1], [0, 0, 1, 1], [], []>} : vector<8x128xf32>, vector<128x64xf32>, vector<8x64xf32> -> vector<8x64xf32>
    %c0_9 = arith.constant 0 : index
    %c0_10 = arith.constant 0 : index
    %13 = vector.load %arg5[%c0_9, %c0_10] : memref<1x64xf32, #tpu.memory_space<vmem>>, vector<1x64xf32>
    %14 = vector.broadcast %13 : vector<1x64xf32> to vector<8x64xf32>
    %15 = arith.addf %12, %14 : vector<8x64xf32>
    %cst_11 = arith.constant 0.000000e+00 : f32
    %16 = vector.broadcast %cst_11 : f32 to vector<8x64xf32>
    %17 = arith.maximumf %15, %16 : vector<8x64xf32>
    %c0_12 = arith.constant 0 : index
    %c0_13 = arith.constant 0 : index
    %18 = vector.load %arg6[%c0_12, %c0_13] : memref<64x22xf32, #tpu.memory_space<vmem>>, vector<64x22xf32>
    %cst_14 = arith.constant dense<0.000000e+00> : vector<8x22xf32>
    %19 = tpu.matmul %17, %18, %cst_14 {dimension_numbers = #tpu.dot_dimension_numbers<[1], [0], [0], [1], [0, 0, 1, 1], [], []>} : vector<8x64xf32>, vector<64x22xf32>, vector<8x22xf32> -> vector<8x22xf32>
    %c0_15 = arith.constant 0 : index
    %c0_16 = arith.constant 0 : index
    %20 = vector.load %arg7[%c0_15, %c0_16] : memref<1x22xf32, #tpu.memory_space<vmem>>, vector<1x22xf32>
    %21 = vector.broadcast %20 : vector<1x22xf32> to vector<8x22xf32>
    %22 = arith.addf %19, %21 : vector<8x22xf32>
    %c0_17 = arith.constant 0 : index
    %c0_18 = arith.constant 0 : index
    %23 = vector.load %arg8[%c0_17, %c0_18] : memref<8x22xf32, #tpu.memory_space<vmem>>, vector<8x22xf32>
    tpu.vector_store %arg8[%c0_17, %c0_18], %22 {strides = array<i32>} : memref<8x22xf32, #tpu.memory_space<vmem>>, vector<8x22xf32>,
    return
  }
  func.func @transform_0(%arg0: i32) -> (i32, i32) {
    %c0_i32 = arith.constant 0 : i32
    %c0_i32_0 = arith.constant 0 : i32
    return %arg0, %c0_i32 : i32, i32
  }
  func.func @transform_1(%arg0: i32) -> (i32, i32) {
    %c0_i32 = arith.constant 0 : i32
    %c0_i32_0 = arith.constant 0 : i32
    %c0_i32_1 = arith.constant 0 : i32
    return %c0_i32, %c0_i32_0 : i32, i32
  }
  func.func @transform_2(%arg0: i32) -> (i32, i32) {
    %c0_i32 = arith.constant 0 : i32
    %c0_i32_0 = arith.constant 0 : i32
    %c0_i32_1 = arith.constant 0 : i32
    return %c0_i32, %c0_i32_0 : i32, i32
  }
  func.func @transform_3(%arg0: i32) -> (i32, i32) {
    %c0_i32 = arith.constant 0 : i32
    %c0_i32_0 = arith.constant 0 : i32
    %c0_i32_1 = arith.constant 0 : i32
    return %c0_i32, %c0_i32_0 : i32, i32
  }
  func.func @transform_4(%arg0: i32) -> (i32, i32) {
    %c0_i32 = arith.constant 0 : i32
    %c0_i32_0 = arith.constant 0 : i32
    %c0_i32_1 = arith.constant 0 : i32
    return %c0_i32, %c0_i32_0 : i32, i32
  }
  func.func @transform_5(%arg0: i32) -> (i32, i32) {
    %c0_i32 = arith.constant 0 : i32
    %c0_i32_0 = arith.constant 0 : i32
    %c0_i32_1 = arith.constant 0 : i32
    return %c0_i32, %c0_i32_0 : i32, i32
  }
  func.func @transform_6(%arg0: i32) -> (i32, i32) {
    %c0_i32 = arith.constant 0 : i32
    %c0_i32_0 = arith.constant 0 : i32
    %c0_i32_1 = arith.constant 0 : i32
    return %c0_i32, %c0_i32_0 : i32, i32
  }
  func.func @transform_7(%arg0: i32) -> (i32, i32) {
    %c0_i32 = arith.constant 0 : i32
    %c0_i32_0 = arith.constant 0 : i32
    return %arg0, %c0_i32 : i32, i32
  }
}

</mosaic_0001>

<bundles_post_ra>
// kernel: tpu_custom_call.1
= control target key start
LH: loop header
LB: loop body
LE: loop exit
PB: predicated region body
PF: predicated region fallthrough
CT: control target
= control target key end

     0   :  { %v485_v1 = vmov 0.0   ;;  %vm486_vm0 = vmmov 0   ;;  %s709_s0 = inlined_call_operand.vmem [shape: f32[8,7], index: 0, kind: input, shape index: {}]   ;;  %s710_s1 = inlined_call_operand.vmem [shape: f32[128,128], index: 1, kind: input, shape index: {}]   ;;  %s711_s2 = inlined_call_operand.vmem [shape: f32[1,128], index: 2, kind: input, shape index: {}]   ;;  %s712_s3 = inlined_call_operand.vmem [shape: f32[128,64], index: 3, kind: input, shape index: {}]   ;;  %s713_s4 = inlined_call_operand.vmem [shape: f32[1,64], index: 4, kind: input, shape index: {}]   ;;  %s714_s5 = inlined_call_operand.vmem [shape: f32[64,22], index: 5, kind: input, shape index: {}]   ;;  %s715_s6 = inlined_call_operand.vmem [shape: f32[1,22], index: 6, kind: input, shape index: {}]   ;;  %s716_s7 = inlined_call_operand.hbm [shape: f32[8,22], index: 7, kind: output, shape index: {}]  }
   0x1   :  { %v45_v0 = vld [vmem:[%s710_s1 + $0x78] sm:$0xff]  ;;  %371 = vmatprep.subr.mxu0 %v485_v1  ;;  %v44_v2 = vld [vmem:[%s710_s1 + $0x70] sm:$0xff]  ;;  %403 = vmatprep.mubr.msk.f32.mxu0 %vm486_vm0, %v485_v1  ;;  %v43_v3 = vld [vmem:[%s710_s1 + $0x68] sm:$0xff] }
   0x2   :  { %372 = vmatpush3.msra.mxu0 %v45_v0  ;;  %406 = vmatprep.subr.mxu1 %v485_v1  ;;  %v42_v4 = vld [vmem:[%s710_s1 + $0x60] sm:$0xff]  ;;  %v139_v5 = vld [vmem:[%s712_s3 + $0x78] sm:$0xff]  ;;  %v138_v6 = vld [vmem:[%s712_s3 + $0x70] sm:$0xff] }
   0x3   :  { %373 = vmatprep.subr.mxu0 %v485_v1  ;;  %438 = vmatprep.mubr.msk.f32.mxu1 %vm486_vm0, %v485_v1  ;;  %v41_v7 = vld [vmem:[%s710_s1 + $0x58] sm:$0xff]  ;;  %v137_v8 = vld [vmem:[%s712_s3 + $0x68] sm:$0xff]  ;;  %v40_v9 = vld [vmem:[%s710_s1 + $0x50] sm:$0xff] }
   0x4   :  { %374 = vmatpush3.msra.mxu0 %v44_v2  ;;  %407 = vmatpush3.msra.mxu1 %v139_v5  ;;  %v136_v10 = vld [vmem:[%s712_s3 + $0x60] sm:$0xff] }
   0x5   :  { %375 = vmatprep.subr.mxu0 %v485_v1  ;;  %408 = vmatprep.subr.mxu1 %v485_v1 }
   0x6   :  { %376 = vmatpush3.msra.mxu0 %v43_v3  ;;  %409 = vmatpush3.msra.mxu1 %v138_v6 }
   0x7   :  { %377 = vmatprep.subr.mxu0 %v485_v1  ;;  %410 = vmatprep.subr.mxu1 %v485_v1 }
   0x8   :  { %378 = vmatpush3.msra.mxu0 %v42_v4  ;;  %411 = vmatpush3.msra.mxu1 %v137_v8 }
   0x9   :  { %379 = vmatprep.subr.mxu0 %v485_v1 }
   0xa   :  { %380 = vmatpush3.msra.mxu0 %v41_v7 }
   0xb   :  { %12 = vsyncpa [#allocation3], 0  ;;  %381 = vmatprep.subr.mxu0 %v485_v1  ;;  %v39_v11 = vld [vmem:[%s710_s1 + $0x48] sm:$0xff]  ;;  %412 = vmatprep.subr.mxu1 %v485_v1  ;;  %v135_v12 = vld [vmem:[%s712_s3 + $0x58] sm:$0xff]  ;;  %vm28_vm1 = vcmask 56320   ;;  %vm233_vm2 = vcmask 523264  }
   0xc   :  { %382 = vmatpush3.msra.mxu0 %v40_v9  ;;  %413 = vmatpush3.msra.mxu1 %v136_v10  ;;  %v38_v13 = vld [vmem:[%s710_s1 + $0x40] sm:$0xff]  ;;  %v134_v14 = vld [vmem:[%s712_s3 + $0x50] sm:$0xff]  ;;  %v37_v15 = vld [vmem:[%s710_s1 + $0x38] sm:$0xff]  ;;  %s487_s15 = smov [#allocation2]   ;;  %vm307_vm3 = vcmask 179200  }
   0xd   :  { %383 = vmatprep.subr.mxu0 %v485_v1  ;;  %414 = vmatprep.subr.mxu1 %v485_v1  ;;  %v133_v16 = vld [vmem:[%s712_s3 + $0x48] sm:$0xff]  ;;  %v36_v17 = vld [vmem:[%s710_s1 + $0x30] sm:$0xff]  ;;  %v132_v18 = vld [vmem:[%s712_s3 + $0x40] sm:$0xff] }
   0xe   :  { %384 = vmatpush3.msra.mxu0 %v39_v11  ;;  %415 = vmatpush3.msra.mxu1 %v135_v12  ;;  %v35_v19 = vld [vmem:[%s710_s1 + $0x28] sm:$0xff]  ;;  %v131_v20 = vld [vmem:[%s712_s3 + $0x38] sm:$0xff]  ;;  %v34_v21 = vld [vmem:[%s710_s1 + $0x20] sm:$0xff] }
   0xf   :  { %385 = vmatprep.subr.mxu0 %v485_v1  ;;  %416 = vmatprep.subr.mxu1 %v485_v1  ;;  %v130_v22 = vld [vmem:[%s712_s3 + $0x30] sm:$0xff]  ;;  %v33_v23 = vld [vmem:[%s710_s1 + $0x18] sm:$0xff]  ;;  %v129_v24 = vld [vmem:[%s712_s3 + $0x28] sm:$0xff] }
  0x10   :  { %386 = vmatpush3.msra.mxu0 %v38_v13  ;;  %417 = vmatpush3.msra.mxu1 %v134_v14  ;;  %v32_v25 = vld [vmem:[%s710_s1 + $0x10] sm:$0xff]  ;;  %v128_v26 = vld [vmem:[%s712_s3 + $0x20] sm:$0xff]  ;;  %v31_v27 = vld [vmem:[%s710_s1 + $0x8] sm:$0xff] }
  0x11   :  { %387 = vmatprep.subr.mxu0 %v485_v1  ;;  %418 = vmatprep.subr.mxu1 %v485_v1  ;;  %v127_v28 = vld [vmem:[%s712_s3 + $0x18] sm:$0xff]  ;;  %v30_v29 = vld [vmem:[%s710_s1] sm:$0xff]  ;;  %v126_v31 = vld [vmem:[%s712_s3 + $0x10] sm:$0xff] }
  0x12   :  { %388 = vmatpush3.msra.mxu0 %v37_v15  ;;  %419 = vmatpush3.msra.mxu1 %v133_v16  ;;  %v27_v30 = vld [vmem:[%s709_s0] sm:$0xff]  ;;  %v125_v32 = vld [vmem:[%s712_s3 + $0x8] sm:$0xff]  ;;  %v225_v34 = vld [vmem:[%s714_s5 + $0x38] sm:$0xff]  ;;  %s315_s0 = sshll.u32 %s487_s15, 4  ;;  %s316_s0 = int_to_ptr.vmem [resolvable:$true] %s315_s0 }
  0x13   :  { %389 = vmatprep.subr.mxu0 %v485_v1  ;;  %420 = vmatprep.subr.mxu1 %v485_v1  ;;  %v124_v33 = vld [vmem:[%s712_s3] sm:$0xff]  ;;  %v224_v35 = vld [vmem:[%s714_s5 + $0x30] sm:$0xff]  ;;  %v223_v36 = vld [vmem:[%s714_s5 + $0x28] sm:$0xff]  ;;  %p468_p1 = scmp.lt.s32.totalorder %s316_s0, %s316_s0 }
  0x14   :  { %390 = vmatpush3.msra.mxu0 %v36_v17  ;;  %421 = vmatpush3.msra.mxu1 %v132_v18  ;;  %v222_v37 = vld [vmem:[%s714_s5 + $0x20] sm:$0xff]  ;;  %v221_v38 = vld [vmem:[%s714_s5 + $0x18] sm:$0xff]  ;;  %v220_v44 = vld [vmem:[%s714_s5 + $0x10] sm:$0xff] }
  0x15   :  { %391 = vmatprep.subr.mxu0 %v485_v1  ;;  %422 = vmatprep.subr.mxu1 %v485_v1  ;;  %v323_v39 = vld [vmem:[%s711_s2] ss:$0 sm:$0xff]  ;;  %v219_v45 = vld [vmem:[%s714_s5 + $0x8] sm:$0xff] }
  0x16   :  { %392 = vmatpush3.msra.mxu0 %v35_v19  ;;  %423 = vmatpush3.msra.mxu1 %v131_v20  ;;  %v218_v46 = vld [vmem:[%s714_s5] sm:$0xff]  ;;  %s463_s5 = scalar_lea.vmem %s316_s0, 128 }
  0x17   :  { %393 = vmatprep.subr.mxu0 %v485_v1  ;;  %424 = vmatprep.subr.mxu1 %v485_v1  ;;  %v325_v47 = vld [vmem:[%s713_s4] ss:$0 sm:$0xff]  ;;  %p464_p0 = scmp.ne.s32.totalorder %s316_s0, %s463_s5  ;;  %p469_p2 = scmp.lt.s32.totalorder %s463_s5, %s463_s5 }
  0x18   :  { %394 = vmatpush3.msra.mxu0 %v34_v21  ;;  %425 = vmatpush3.msra.mxu1 %v130_v22  ;;  %v326_v52 = vld [vmem:[%s715_s6] ss:$0 sm:$0xff] }
  0x19   :  { %395 = vmatprep.subr.mxu0 %v485_v1  ;;  %426 = vmatprep.subr.mxu1 %v485_v1  ;;  %p470_p3 = por %p469_p2, %p468_p1 }
  0x1a   :  { %396 = vmatpush3.msra.mxu0 %v33_v23  ;;  %427 = vmatpush3.msra.mxu1 %v129_v24 }
  0x1b   :  { %397 = vmatprep.subr.mxu0 %v485_v1  ;;  %428 = vmatprep.subr.mxu1 %v485_v1  ;;  %p471_p4 = pnand %p470_p3, %p464_p0 }
  0x1c   :  { %398 = vmatpush3.msra.mxu0 %v32_v25  ;;  %429 = vmatpush3.msra.mxu1 %v128_v26 }
  0x1d   :  { %399 = vmatprep.subr.mxu0 %v485_v1  ;;  %430 = vmatprep.subr.mxu1 %v485_v1 }
  0x1e   :  { %400 = vmatpush3.msra.mxu0 %v31_v27  ;;  %431 = vmatpush3.msra.mxu1 %v127_v28 }
  0x1f   :  { %401 = vmatprep.subr.mxu0 %v485_v1  ;;  %432 = vmatprep.subr.mxu1 %v485_v1 }
  0x20   :  { %402 = vmatpush3.msra.mxu0 %v30_v29  ;;  %433 = vmatpush3.msra.mxu1 %v126_v31 }
  0x21   :  { %404 = vmatmul.mubr.msk.f32.vlgmr.msra.gmra.mxu0 %vm28_vm1, %v27_v30  ;;  %441 = vmatprep.subr.mxu0 %v485_v1 }
  0x22   :  { %457 = vmatprep.mubr.msk.f32.mxu0 %vm486_vm0, %v485_v1  ;;  %434 = vmatprep.subr.mxu1 %v485_v1 }
  0x23   :  { %435 = vmatpush3.msra.mxu1 %v125_v32  ;;  %442 = vmatpush3.msra.mxu0 %v225_v34 }
  0x24   :  { %436 = vmatprep.subr.mxu1 %v485_v1  ;;  %443 = vmatprep.subr.mxu0 %v485_v1 }
  0x25   :  { %437 = vmatpush3.msra.mxu1 %v124_v33  ;;  %444 = vmatpush3.msra.mxu0 %v224_v35 }
  0x26   :  { %445 = vmatprep.subr.mxu0 %v485_v1 }
  0x27   :  { %446 = vmatpush3.msra.mxu0 %v223_v36 }
  0x28   :  { %447 = vmatprep.subr.mxu0 %v485_v1 }
  0x29   :  { %448 = vmatpush3.msra.mxu0 %v222_v37 }
  0x2a   :  { %449 = vmatprep.subr.mxu0 %v485_v1 }
  0x2b   :  { %450 = vmatpush3.msra.mxu0 %v221_v38 }
  0x2c   :  { %451 = vmatprep.subr.mxu0 %v485_v1 }
  0x2d   :  { %452 = vmatpush3.msra.mxu0 %v220_v44 }
  0x2e   :  { %453 = vmatprep.subr.mxu0 %v485_v1 }
  0x2f   :  { %454 = vmatpush3.msra.mxu0 %v219_v45 }
  0x30   :  { %455 = vmatprep.subr.mxu0 %v485_v1 }
  0x31   :  { %456 = vmatpush3.msra.mxu0 %v218_v46 }
  0xe1   :  { %v119_v40 = vpop.f32.mrf.mxu0 }
  0xe2   :  { %v120_v41 = vadd.f32 %v323_v39, %v119_v40 }
  0xe3   :  { %v405_v42 = vpop.f32.mrf.mxu0 }
  0xe4   :  { %v123_v43 = vmax.f32 %v120_v41, 0.0 }
  0xe6   :  { %439 = vmatmul.mubr.f32.vlgmr.msra.gmra.mxu1 %v123_v43 }
 0x1a6   :  { %v213_v48 = vpop.f32.mrf.mxu1 }
 0x1a7   :  { %v214_v49 = vadd.f32 %v325_v47, %v213_v48 }
 0x1a8   :  { %v440_v50 = vpop.f32.mrf.mxu1 }
 0x1a9   :  { %v217_v51 = vmax.f32 %v214_v49, 0.0 }
 0x1ab   :  { %458 = vmatmul.mubr.msk.f32.vlgmr.msra.gmra.mxu0 %vm233_vm2, %v217_v51 }
 0x26b   :  { %v303_v53 = vpop.f32.mrf.mxu0 }
 0x26c   :  { %v304_v54 = vadd.f32 %v326_v52, %v303_v53 }
 0x26d   :  { %v459_v55 = vpop.f32.mrf.mxu0 }
 0x26e   :  { %308 = vst.msk [vmem:[#allocation2] sm:$0xff] %vm307_vm3, %v304_v54 }
 0x26f   :  { %474 = shalt.err (!%p471_p4)
}
 0x270   :  { %318 = dma.vmem_to_hbm [thread:$0]  %s316_s0, 128, %s716_s7, [#allocation3]  }
 0x271   :  { %483 = dma.done.wait [#allocation3], 128  }
 0x272   :  { %484 = vsyncadd [#allocation3], 4294967168 }
 0x273   :  { %322 = vsyncpa [#allocation3], 1 }

</bundles_post_ra>
